<compile_context>
chip_gen: v6e
topology: v6e:2x2x1
jax: 0.10.0
libtpu: 0.0.40
codegen_flags: <defaults>
</compile_context>

<pallas_src>
import jax
import jax.numpy as jnp
from jax.experimental import pallas as pl
from jax.experimental.pallas import tpu as pltpu

N_FEATURES = 2  # `n` in the PyTorch module


def _linear_relu_cat_tanh_kernel(x_ref, p_ref, o_ref):
    # x_ref: (1, 1) f32 in SMEM; p_ref: (2, N) f32 in VMEM (row0 = W^T, row1 = b)
    x = x_ref[0, 0]                      # scalar load from SMEM
    w = p_ref[0:1, :]                    # (1, N)
    b = p_ref[1:2, :]                    # (1, N)

    # y1 = x @ W^T + b  ==  scalar-broadcast FMA on the VPU.
    y1 = x * w + b                       # (1, N)

    # Single EUP pass; relu half derived from it (exact rewrite).
    t = jnp.tanh(y1)                     # (1, N)
    stacked = jnp.concatenate([t, jnp.maximum(t, 0.0)], axis=0)  # (2, N)

    # One unmasked full-block store (no serialized partial-row RMW stores).
    o_ref[...] = stacked.astype(o_ref.dtype)


def init_params(weight, bias):
    """One-time parameter prep (out of the per-call hot path).

    weight: (N, 1) as in torch.nn.Linear(1, N); bias: (N,).
    Returns a single fused (2, N) array: row 0 = W^T, row 1 = bias.
    """
    n = weight.shape[0]
    w_t = jnp.transpose(weight)          # (1, N)
    b2d = bias.reshape(1, n)             # (1, N)
    return jnp.concatenate([w_t, b2d], axis=0)   # (2, N)


def model_forward(x, params):
    """x: (1, 1) f32; params: (2, N) fused W^T/bias.  Returns (2, N)."""
    assert x.shape == (1, 1), "kernel specialized to the module's (1, 1) input"
    n = params.shape[1]
    return pl.pallas_call(
        _linear_relu_cat_tanh_kernel,
        out_shape=jax.ShapeDtypeStruct((2, n), x.dtype),
        in_specs=[
            pl.BlockSpec(memory_space=pltpu.SMEM),   # x: scalar in SMEM
            pl.BlockSpec(memory_space=pltpu.VMEM),   # fused (W^T; b)
        ],
        out_specs=pl.BlockSpec(memory_space=pltpu.VMEM),
    )(x, params)


def _reference(x, weight, bias):
    y1 = x @ weight.T + bias
    y2 = jnp.maximum(y1, 0.0)
    return jnp.tanh(jnp.concatenate([y1, y2], axis=0))


if __name__ == "__main__":
    key = jax.random.PRNGKey(0)
    kx, kw, kb = jax.random.split(key, 3)

    # Input matches the module's `x = torch.randn(1, 1)`.
    x = jax.random.normal(kx, (1, 1), dtype=jnp.float32)

    # Deterministic parameter init for Linear(1, N_FEATURES).
    weight = jax.random.normal(kw, (N_FEATURES, 1), dtype=jnp.float32)
    bias = jax.random.normal(kb, (N_FEATURES,), dtype=jnp.float32)

    # One-time fused parameter layout prep (init-time, not per-call).
    params = init_params(weight, bias)

    out = model_forward(x, params)
    out = jax.block_until_ready(out)

    ref = _reference(x, weight, bias)
    assert out.shape == (2 * x.shape[0], N_FEATURES)
    assert jnp.allclose(out, ref, atol=1e-5, rtol=1e-5)

    print("KERNEL_OK")
</pallas_src>

<mosaic_0001>
module attributes {stable_mosaic.version = 11 : i64} {
  func.func @_linear_relu_cat_tanh_kernel(%arg0: memref<1x1xf32, #tpu.memory_space<smem>>, %arg1: memref<2x2xf32, #tpu.memory_space<vmem>>, %arg2: memref<2x2xf32, #tpu.memory_space<vmem>>) attributes {dimension_semantics = [], scalar_prefetch = 0 : i64, scratch_operands = 0 : i64, tpu.core_type = #tpu.core_type<tc>} {
    %c0 = arith.constant 0 : index
    %c0_0 = arith.constant 0 : index
    %0 = memref.load %arg0[%c0, %c0_0] : memref<1x1xf32, #tpu.memory_space<smem>>
    %c0_1 = arith.constant 0 : index
    %c0_2 = arith.constant 0 : index
    %1 = vector.load %arg1[%c0_1, %c0_2] : memref<2x2xf32, #tpu.memory_space<vmem>>, vector<1x2xf32>
    %c1 = arith.constant 1 : index
    %c0_3 = arith.constant 0 : index
    %2 = vector.load %arg1[%c1, %c0_3] : memref<2x2xf32, #tpu.memory_space<vmem>>, vector<1x2xf32>
    %3 = vector.broadcast %0 : f32 to vector<1x2xf32>
    %4 = arith.mulf %3, %1 : vector<1x2xf32>
    %5 = arith.addf %4, %2 : vector<1x2xf32>
    %6 = math.tanh %5 : vector<1x2xf32>
    %cst = arith.constant 0.000000e+00 : f32
    %7 = vector.broadcast %cst : f32 to vector<1x2xf32>
    %8 = arith.maximumf %6, %7 : vector<1x2xf32>
    %9 = tpu.concatenate %6, %8 in 0 : vector<1x2xf32>, vector<1x2xf32> -> vector<2x2xf32>
    %c0_4 = arith.constant 0 : index
    %c0_5 = arith.constant 0 : index
    %10 = vector.load %arg2[%c0_4, %c0_5] : memref<2x2xf32, #tpu.memory_space<vmem>>, vector<2x2xf32>
    tpu.vector_store %arg2[%c0_4, %c0_5], %9 {strides = array<i32>} : memref<2x2xf32, #tpu.memory_space<vmem>>, vector<2x2xf32>,
    return
  }
}

</mosaic_0001>

<bundles_post_ra>
// kernel: tpu_custom_call.1
= control target key start
LH: loop header
LB: loop body
LE: loop exit
PB: predicated region body
PF: predicated region fallthrough
CT: control target
= control target key end

     0   :  { %s95_s0 = inlined_call_operand.<no memory space> [shape: f32[1,1], index: 0, kind: input, shape index: {}]   ;;  %s96_s1 = inlined_call_operand.vmem [shape: f32[2,2], index: 1, kind: input, shape index: {}]   ;;  %s97_s2 = inlined_call_operand.hbm [shape: f32[2,2], index: 2, kind: output, shape index: {}]  }
   0x1   :  { %v14_v0 = vld [vmem:[%s96_s1] sm:$0x1]  ;;  %v15_v1 = vld [vmem:[%s96_s1 + $0x1] sm:$0x1]  ;;  %v16_v2 = vstv %s95_s0 }
   0x2   :  { %v17_v3 = vmul.f32 %v16_v2, %v14_v0 }
   0x3   :  { %8 = vsyncpa [#allocation4], 0  ;;  %s67_s15 = smov [#allocation3]   ;;  %vm24_vm0 = vcmask 1040384   ;;  %vm26_vm1 = vcmask 9216  }
   0x4   :  { %v18_v4 = vadd.f32 %v17_v3, %v15_v1  ;;  %s34_s16 = sshll.u32 %s67_s15, 4  ;;  %s35_s16 = int_to_ptr.vmem [resolvable:$true] %s34_s16 }
   0x5   :  { %s45_s17 = scalar_lea.vmem %s35_s16, 32  ;;  %p50_p1 = scmp.lt.s32.totalorder %s35_s16, %s35_s16 }
   0x6   :  { %43 = vtanh.f32 %v18_v4  ;;  %p46_p0 = scmp.ne.s32.totalorder %s35_s16, %s45_s17  ;;  %p51_p2 = scmp.lt.s32.totalorder %s45_s17, %s45_s17 }
   0x8   :  { %p52_p3 = por %p51_p2, %p50_p1 }
   0xa   :  { %p53_p4 = pnand %p52_p3, %p46_p0 }
  0x13   :  { %v44_v5 = vpop.eup %43 }
  0x14   :  { %v20_v6 = vmax.f32 %v44_v5, 0.0 }
  0x16   :  { %v22_v7 = vrot.slane %v20_v6, 7 }
  0x18   :  { %v25_v8 = vsel %vm24_vm0, %v44_v5, %v22_v7 }
  0x19   :  { %27 = vst.msk [vmem:[#allocation3] sm:$0x3] %vm26_vm1, %v25_v8 }
  0x1a   :  { %56 = shalt.err (!%p53_p4)
}
  0x1b   :  { %37 = dma.vmem_to_hbm [thread:$0]  %s35_s16, 32, %s97_s2, [#allocation4]  }
  0x1c   :  { %65 = dma.done.wait [#allocation4], 32  }
  0x1d   :  { %66 = vsyncadd [#allocation4], 4294967264 }
  0x1e   :  { %41 = vsyncpa [#allocation4], 1 }

</bundles_post_ra>
